<compile_context>
chip_gen: v7x
topology: tpu7x:2x2x1
jax: 0.10.0
libtpu: 0.0.40
codegen_flags: <defaults>
</compile_context>

<pallas_src>
import numpy as np
import jax
import jax.numpy as jnp
from jax import lax
from jax.experimental import pallas as pl
from jax.experimental.pallas import tpu as pltpu


# ----------------------------------------------------------------------------
# Pallas kernel: fused matmul chain  (conv1 -> conv2 -> fc1 -> fc2)
# ----------------------------------------------------------------------------
def atari_cnn_kernel(x_ref, w1_ref, b1_ref, w2_ref, b2_ref,
                     w3_ref, b3_ref, w4_ref, b4_ref, o_ref):
    # x arrives as f32 straight from HBM; cast to bf16 on-chip (VPU work that
    # hides under the MXU/DMA) instead of paying an extra HBM pass outside.
    x = x_ref[...].astype(jnp.bfloat16)                               # (tm, 1280)
    # conv1 as matmul (NCHW-flatten permutation baked into W1 rows) + ReLU
    h = jnp.dot(x, w1_ref[...], preferred_element_type=jnp.float32)
    h = jnp.maximum(h + b1_ref[...], 0.0).astype(jnp.bfloat16)        # (tm, 256)
    # conv2 as matmul (+ PyTorch flatten baked into W2 columns) + ReLU
    h = jnp.dot(h, w2_ref[...], preferred_element_type=jnp.float32)
    h = jnp.maximum(h + b2_ref[...], 0.0).astype(jnp.bfloat16)        # (tm, 128)
    # fc1 + ReLU
    h = jnp.dot(h, w3_ref[...], preferred_element_type=jnp.float32)
    h = jnp.maximum(h + b3_ref[...], 0.0).astype(jnp.bfloat16)        # (tm, 256)
    # fc2 (no activation; output padded to 128 lanes -> unmasked lane-dense
    # stores).  Stored in bf16 to halve output writeback traffic.
    o = jnp.dot(h, w4_ref[...], preferred_element_type=jnp.float32) + b4_ref[...]
    o_ref[...] = o.astype(o_ref.dtype)


# ----------------------------------------------------------------------------
# Parameter construction (deterministic, synthetic)
# ----------------------------------------------------------------------------
def make_params(key):
    ks = jax.random.split(key, 8)
    w1 = 0.1 * jax.random.normal(ks[0], (16, 5, 4, 4), jnp.float32)   # conv1
    b1 = 0.1 * jax.random.normal(ks[1], (16,), jnp.float32)
    w2 = 0.1 * jax.random.normal(ks[2], (32, 16, 2, 2), jnp.float32)  # conv2
    b2 = 0.1 * jax.random.normal(ks[3], (32,), jnp.float32)
    fw1 = 0.1 * jax.random.normal(ks[4], (256, 128), jnp.float32)     # fc1
    fb1 = 0.1 * jax.random.normal(ks[5], (256,), jnp.float32)
    fw2 = 0.1 * jax.random.normal(ks[6], (6, 256), jnp.float32)       # fc2
    fb2 = 0.1 * jax.random.normal(ks[7], (6,), jnp.float32)
    return dict(w1=w1, b1=b1, w2=w2, b2=b2, fw1=fw1, fb1=fb1, fw2=fw2, fb2=fb2)


def fold_weights(p):
    """One-time, host-side weight folding.  Call once; reuse the result."""
    # conv1 -> (1280, 256).  Input row index is the plain NCHW flatten:
    #   row = c*256 + (4*oh+kh)*16 + (4*ow+kw)
    # Hidden (column) layout: col = (oh*4+ow)*16 + c_out.
    w1 = np.asarray(p["w1"])                                   # (16, 5, 4, 4)
    W1 = np.zeros((1280, 256), np.float32)
    for oh in range(4):
        for ow in range(4):
            col0 = (oh * 4 + ow) * 16
            for c in range(5):
                for kh in range(4):
                    for kw in range(4):
                        row = c * 256 + (4 * oh + kh) * 16 + (4 * ow + kw)
                        W1[row, col0:col0 + 16] = w1[:, c, kh, kw]
    b1 = np.tile(np.asarray(p["b1"]), 16)[None, :]             # (1, 256)

    # conv2 + flatten: hidden layout (pos1*16 + c1) -> PyTorch flatten layout
    # (c2*4 + OH*2 + OW) via a scattered (256, 128) matrix.
    w2 = np.asarray(p["w2"])                                   # (32, 16, 2, 2)
    W2 = np.zeros((256, 128), np.float32)
    for c2 in range(32):
        for OH in range(2):
            for OW in range(2):
                out_idx = c2 * 4 + OH * 2 + OW
                for c1 in range(16):
                    for kh in range(2):
                        for kw in range(2):
                            pos1 = (2 * OH + kh) * 4 + (2 * OW + kw)
                            W2[pos1 * 16 + c1, out_idx] = w2[c2, c1, kh, kw]
    b2 = np.repeat(np.asarray(p["b2"]), 4)[None, :]            # (1, 128)

    W3 = np.asarray(p["fw1"]).T                                # (128, 256)
    b3 = np.asarray(p["fb1"])[None, :]                         # (1, 256)

    # fc2 zero-padded from 6 to 128 output lanes (lane-dense store path).
    W4 = np.zeros((256, 128), np.float32)
    W4[:, :6] = np.asarray(p["fw2"]).T
    b4 = np.zeros((1, 128), np.float32)
    b4[0, :6] = np.asarray(p["fb2"])

    # Matmul operands in bf16 (native MXU path, half the DMA bytes); biases f32.
    return (jnp.asarray(W1, jnp.bfloat16), jnp.asarray(b1, jnp.float32),
            jnp.asarray(W2, jnp.bfloat16), jnp.asarray(b2, jnp.float32),
            jnp.asarray(W3, jnp.bfloat16), jnp.asarray(b3, jnp.float32),
            jnp.asarray(W4, jnp.bfloat16), jnp.asarray(b4, jnp.float32))


# ----------------------------------------------------------------------------
# Wrapper
# ----------------------------------------------------------------------------
def _round_up(x, m):
    return ((x + m - 1) // m) * m


def _vmem_capacity_bytes():
    try:
        return int(pltpu.get_tpu_info().vmem_capacity_bytes)
    except Exception:
        return 64 << 20          # conservative (v7x-sized) fallback


def deepmind_atari_cnn_pallas(x, folded):
    """x: (N, 5, 16, 16) f32.  folded: output of fold_weights()."""
    N = x.shape[0]
    # Plain NCHW flatten (contiguous reshape -> free); x stays f32, the
    # bf16 cast happens inside the kernel.  No extra HBM pass over x.
    x_flat = x.reshape(N, 5 * 16 * 16)                         # (N, 1280) f32

    # Pad the batch only to the 8-row sublane multiple (<= 7 extra rows).
    n_rows = _round_up(max(N, 1), 8)
    if n_rows != N:
        x_flat = jnp.pad(x_flat, ((0, n_rows - N), (0, 0)))

    # Per-generation VMEM budget: 128 MiB chips (v5e/v6e) -> tm<=2048 with a
    # 96 MiB scoped limit; 64 MiB chips (v7x) -> tm<=1024 with a 48 MiB limit.
    vmem = _vmem_capacity_bytes()
    tile_cap = 2048 if vmem >= (100 << 20) else 1024
    vmem_limit = int(min(vmem - (16 << 20), 96 << 20))

    # Batch tile: multiple of 8 sublanes; aim for >= 2 grid steps so the
    # "parallel" axis can be split across v7x's 2 TensorCores.  The last grid
    # block may be partial -- no rounding of n_rows up to a tile multiple.
    tm = max(8, min(tile_cap, _round_up(pl.cdiv(n_rows, 2), 8)))
    grid = (pl.cdiv(n_rows, tm),)

    W1, b1, W2, b2, W3, b3, W4, b4 = folded

    def const(shape):
        # Weights/biases: same block every grid step -> stay VMEM-resident.
        return pl.BlockSpec(shape, lambda i: (0, 0))

    flops_per_row = 2 * (1280 * 256 + 256 * 128 + 128 * 256 + 256 * 128)
    weight_bytes = (2 * (1280 * 256 + 256 * 128 + 128 * 256 + 256 * 128)
                    + 4 * (256 + 128 + 256 + 128))
    cost = pl.CostEstimate(
        flops=n_rows * flops_per_row,
        transcendentals=0,
        bytes_accessed=n_rows * 1280 * 4      # f32 input
                       + n_rows * 128 * 2     # bf16 output
                       + weight_bytes)

    out = pl.pallas_call(
        atari_cnn_kernel,
        out_shape=jax.ShapeDtypeStruct((n_rows, 128), jnp.bfloat16),
        grid=grid,
        in_specs=[
            pl.BlockSpec((tm, 1280), lambda i: (i, 0)),        # x tile (pipelined)
            const(W1.shape), const(b1.shape),
            const(W2.shape), const(b2.shape),
            const(W3.shape), const(b3.shape),
            const(W4.shape), const(b4.shape),
        ],
        out_specs=pl.BlockSpec((tm, 128), lambda i: (i, 0)),
        compiler_params=pltpu.CompilerParams(
            dimension_semantics=("parallel",),
            vmem_limit_bytes=vmem_limit),
        cost_estimate=cost,
    )(x_flat, W1, b1, W2, b2, W3, b3, W4, b4)

    # Slice off the 6 real logits and return f32 (module's output dtype).
    return out[:N, :6].astype(jnp.float32)


# Pure-JAX reference (mirrors the PyTorch module exactly).
def deepmind_atari_cnn_ref(x, p):
    dn = ("NCHW", "OIHW", "NCHW")
    y = lax.conv_general_dilated(x, p["w1"], (4, 4), "VALID", dimension_numbers=dn)
    y = jax.nn.relu(y + p["b1"][None, :, None, None])
    y = lax.conv_general_dilated(y, p["w2"], (2, 2), "VALID", dimension_numbers=dn)
    y = jax.nn.relu(y + p["b2"][None, :, None, None])
    y = y.reshape(y.shape[0], -1)                              # flatten C,H,W
    y = jax.nn.relu(y @ p["fw1"].T + p["fb1"])
    return y @ p["fw2"].T + p["fb2"]


if __name__ == "__main__":
    key = jax.random.PRNGKey(0)
    kx, kp = jax.random.split(key)
    # fc1 expects 128 flattened features => 16x16 input spatial, 5 channels.
    x = jax.random.normal(kx, (2, 5, 16, 16), jnp.float32)
    params = make_params(kp)
    folded = fold_weights(params)          # folded once, outside the call path

    out = deepmind_atari_cnn_pallas(x, folded)
    out = jax.block_until_ready(out)

    ref = deepmind_atari_cnn_ref(x, params)
    # bf16 activations/weights through 4 matmul stages + bf16 output store
    # -> relaxed tolerance.
    np.testing.assert_allclose(np.asarray(out), np.asarray(ref),
                               rtol=5e-2, atol=5e-2)
    print("KERNEL_OK")
</pallas_src>

<mosaic_0001>
module attributes {stable_mosaic.version = 11 : i64} {
  func.func @atari_cnn_kernel(%arg0: i32, %arg1: memref<8x1280xf32, #tpu.memory_space<vmem>>, %arg2: memref<1280x256xbf16, #tpu.memory_space<vmem>>, %arg3: memref<1x256xf32, #tpu.memory_space<vmem>>, %arg4: memref<256x128xbf16, #tpu.memory_space<vmem>>, %arg5: memref<1x128xf32, #tpu.memory_space<vmem>>, %arg6: memref<128x256xbf16, #tpu.memory_space<vmem>>, %arg7: memref<1x256xf32, #tpu.memory_space<vmem>>, %arg8: memref<256x128xbf16, #tpu.memory_space<vmem>>, %arg9: memref<1x128xf32, #tpu.memory_space<vmem>>, %arg10: memref<8x128xbf16, #tpu.memory_space<vmem>>) attributes {dimension_semantics = [#tpu.dimension_semantics<parallel>], iteration_bounds = array<i64: 1>, scalar_prefetch = 0 : i64, scratch_operands = 0 : i64, tpu.core_type = #tpu.core_type<tc>, window_params = [{transform_indices = @transform_0, window_bounds = array<i64: 8, 1280>}, {pipeline_mode = #tpu.pipeline_mode<synchronous>, transform_indices = @transform_1, window_bounds = array<i64: 1280, 256>}, {pipeline_mode = #tpu.pipeline_mode<synchronous>, transform_indices = @transform_2, window_bounds = array<i64: 1, 256>}, {pipeline_mode = #tpu.pipeline_mode<synchronous>, transform_indices = @transform_3, window_bounds = array<i64: 256, 128>}, {pipeline_mode = #tpu.pipeline_mode<synchronous>, transform_indices = @transform_4, window_bounds = array<i64: 1, 128>}, {pipeline_mode = #tpu.pipeline_mode<synchronous>, transform_indices = @transform_5, window_bounds = array<i64: 128, 256>}, {pipeline_mode = #tpu.pipeline_mode<synchronous>, transform_indices = @transform_6, window_bounds = array<i64: 1, 256>}, {pipeline_mode = #tpu.pipeline_mode<synchronous>, transform_indices = @transform_7, window_bounds = array<i64: 256, 128>}, {pipeline_mode = #tpu.pipeline_mode<synchronous>, transform_indices = @transform_8, window_bounds = array<i64: 1, 128>}, {transform_indices = @transform_9, window_bounds = array<i64: 8, 128>}]} {
    %c0 = arith.constant 0 : index
    %c0_0 = arith.constant 0 : index
    %0 = vector.load %arg1[%c0, %c0_0] : memref<8x1280xf32, #tpu.memory_space<vmem>>, vector<8x1280xf32>
    %1 = arith.truncf %0 : vector<8x1280xf32> to vector<8x1280xbf16>
    %c0_1 = arith.constant 0 : index
    %c0_2 = arith.constant 0 : index
    %2 = vector.load %arg2[%c0_1, %c0_2] : memref<1280x256xbf16, #tpu.memory_space<vmem>>, vector<1280x256xbf16>
    %cst = arith.constant dense<0.000000e+00> : vector<8x256xf32>
    %3 = tpu.matmul %1, %2, %cst {dimension_numbers = #tpu.dot_dimension_numbers<[1], [0], [0], [1], [0, 0, 1, 1], [], []>} : vector<8x1280xbf16>, vector<1280x256xbf16>, vector<8x256xf32> -> vector<8x256xf32>
    %c0_3 = arith.constant 0 : index
    %c0_4 = arith.constant 0 : index
    %4 = vector.load %arg3[%c0_3, %c0_4] : memref<1x256xf32, #tpu.memory_space<vmem>>, vector<1x256xf32>
    %5 = vector.broadcast %4 : vector<1x256xf32> to vector<8x256xf32>
    %6 = arith.addf %3, %5 : vector<8x256xf32>
    %cst_5 = arith.constant 0.000000e+00 : f32
    %7 = vector.broadcast %cst_5 : f32 to vector<8x256xf32>
    %8 = arith.maximumf %6, %7 : vector<8x256xf32>
    %9 = arith.truncf %8 : vector<8x256xf32> to vector<8x256xbf16>
    %c0_6 = arith.constant 0 : index
    %c0_7 = arith.constant 0 : index
    %10 = vector.load %arg4[%c0_6, %c0_7] : memref<256x128xbf16, #tpu.memory_space<vmem>>, vector<256x128xbf16>
    %cst_8 = arith.constant dense<0.000000e+00> : vector<8x128xf32>
    %11 = tpu.matmul %9, %10, %cst_8 {dimension_numbers = #tpu.dot_dimension_numbers<[1], [0], [0], [1], [0, 0, 1, 1], [], []>} : vector<8x256xbf16>, vector<256x128xbf16>, vector<8x128xf32> -> vector<8x128xf32>
    %c0_9 = arith.constant 0 : index
    %c0_10 = arith.constant 0 : index
    %12 = vector.load %arg5[%c0_9, %c0_10] : memref<1x128xf32, #tpu.memory_space<vmem>>, vector<1x128xf32>
    %13 = vector.broadcast %12 : vector<1x128xf32> to vector<8x128xf32>
    %14 = arith.addf %11, %13 : vector<8x128xf32>
    %cst_11 = arith.constant 0.000000e+00 : f32
    %15 = vector.broadcast %cst_11 : f32 to vector<8x128xf32>
    %16 = arith.maximumf %14, %15 : vector<8x128xf32>
    %17 = arith.truncf %16 : vector<8x128xf32> to vector<8x128xbf16>
    %c0_12 = arith.constant 0 : index
    %c0_13 = arith.constant 0 : index
    %18 = vector.load %arg6[%c0_12, %c0_13] : memref<128x256xbf16, #tpu.memory_space<vmem>>, vector<128x256xbf16>
    %cst_14 = arith.constant dense<0.000000e+00> : vector<8x256xf32>
    %19 = tpu.matmul %17, %18, %cst_14 {dimension_numbers = #tpu.dot_dimension_numbers<[1], [0], [0], [1], [0, 0, 1, 1], [], []>} : vector<8x128xbf16>, vector<128x256xbf16>, vector<8x256xf32> -> vector<8x256xf32>
    %c0_15 = arith.constant 0 : index
    %c0_16 = arith.constant 0 : index
    %20 = vector.load %arg7[%c0_15, %c0_16] : memref<1x256xf32, #tpu.memory_space<vmem>>, vector<1x256xf32>
    %21 = vector.broadcast %20 : vector<1x256xf32> to vector<8x256xf32>
    %22 = arith.addf %19, %21 : vector<8x256xf32>
    %cst_17 = arith.constant 0.000000e+00 : f32
    %23 = vector.broadcast %cst_17 : f32 to vector<8x256xf32>
    %24 = arith.maximumf %22, %23 : vector<8x256xf32>
    %25 = arith.truncf %24 : vector<8x256xf32> to vector<8x256xbf16>
    %c0_18 = arith.constant 0 : index
    %c0_19 = arith.constant 0 : index
    %26 = vector.load %arg8[%c0_18, %c0_19] : memref<256x128xbf16, #tpu.memory_space<vmem>>, vector<256x128xbf16>
    %cst_20 = arith.constant dense<0.000000e+00> : vector<8x128xf32>
    %27 = tpu.matmul %25, %26, %cst_20 {dimension_numbers = #tpu.dot_dimension_numbers<[1], [0], [0], [1], [0, 0, 1, 1], [], []>} : vector<8x256xbf16>, vector<256x128xbf16>, vector<8x128xf32> -> vector<8x128xf32>
    %c0_21 = arith.constant 0 : index
    %c0_22 = arith.constant 0 : index
    %28 = vector.load %arg9[%c0_21, %c0_22] : memref<1x128xf32, #tpu.memory_space<vmem>>, vector<1x128xf32>
    %29 = vector.broadcast %28 : vector<1x128xf32> to vector<8x128xf32>
    %30 = arith.addf %27, %29 : vector<8x128xf32>
    %31 = arith.truncf %30 : vector<8x128xf32> to vector<8x128xbf16>
    %c0_23 = arith.constant 0 : index
    %c0_24 = arith.constant 0 : index
    %32 = vector.load %arg10[%c0_23, %c0_24] : memref<8x128xbf16, #tpu.memory_space<vmem>>, vector<8x128xbf16>
    tpu.vector_store %arg10[%c0_23, %c0_24], %31 {strides = array<i32>} : memref<8x128xbf16, #tpu.memory_space<vmem>>, vector<8x128xbf16>,
    return
  }
  func.func @transform_0(%arg0: i32) -> (i32, i32) {
    %c0_i32 = arith.constant 0 : i32
    %c0_i32_0 = arith.constant 0 : i32
    return %arg0, %c0_i32 : i32, i32
  }
  func.func @transform_1(%arg0: i32) -> (i32, i32) {
    %c0_i32 = arith.constant 0 : i32
    %c0_i32_0 = arith.constant 0 : i32
    %c0_i32_1 = arith.constant 0 : i32
    return %c0_i32, %c0_i32_0 : i32, i32
  }
  func.func @transform_2(%arg0: i32) -> (i32, i32) {
    %c0_i32 = arith.constant 0 : i32
    %c0_i32_0 = arith.constant 0 : i32
    %c0_i32_1 = arith.constant 0 : i32
    return %c0_i32, %c0_i32_0 : i32, i32
  }
  func.func @transform_3(%arg0: i32) -> (i32, i32) {
    %c0_i32 = arith.constant 0 : i32
    %c0_i32_0 = arith.constant 0 : i32
    %c0_i32_1 = arith.constant 0 : i32
    return %c0_i32, %c0_i32_0 : i32, i32
  }
  func.func @transform_4(%arg0: i32) -> (i32, i32) {
    %c0_i32 = arith.constant 0 : i32
    %c0_i32_0 = arith.constant 0 : i32
    %c0_i32_1 = arith.constant 0 : i32
    return %c0_i32, %c0_i32_0 : i32, i32
  }
  func.func @transform_5(%arg0: i32) -> (i32, i32) {
    %c0_i32 = arith.constant 0 : i32
    %c0_i32_0 = arith.constant 0 : i32
    %c0_i32_1 = arith.constant 0 : i32
    return %c0_i32, %c0_i32_0 : i32, i32
  }
  func.func @transform_6(%arg0: i32) -> (i32, i32) {
    %c0_i32 = arith.constant 0 : i32
    %c0_i32_0 = arith.constant 0 : i32
    %c0_i32_1 = arith.constant 0 : i32
    return %c0_i32, %c0_i32_0 : i32, i32
  }
  func.func @transform_7(%arg0: i32) -> (i32, i32) {
    %c0_i32 = arith.constant 0 : i32
    %c0_i32_0 = arith.constant 0 : i32
    %c0_i32_1 = arith.constant 0 : i32
    return %c0_i32, %c0_i32_0 : i32, i32
  }
  func.func @transform_8(%arg0: i32) -> (i32, i32) {
    %c0_i32 = arith.constant 0 : i32
    %c0_i32_0 = arith.constant 0 : i32
    %c0_i32_1 = arith.constant 0 : i32
    return %c0_i32, %c0_i32_0 : i32, i32
  }
  func.func @transform_9(%arg0: i32) -> (i32, i32) {
    %c0_i32 = arith.constant 0 : i32
    %c0_i32_0 = arith.constant 0 : i32
    return %arg0, %c0_i32 : i32, i32
  }
}

</mosaic_0001>

<bundles_post_ra>
// kernel: tpu_custom_call.1
= control target key start
LH: loop header
LB: loop body
LE: loop exit
PB: predicated region body
PF: predicated region fallthrough
CT: control target
= control target key end

     0   :  { %14 = vsyncpa [#allocation3], 0  ;;  %s2699_s0 = inlined_call_operand.hbm [shape: f32[8,1280], index: 0, kind: input, shape index: {}]   ;;  %s2700_s1 = inlined_call_operand.hbm [shape: bf16[1280,256], index: 1, kind: input, shape index: {}]   ;;  %s2701_s2 = inlined_call_operand.vmem [shape: f32[1,256], index: 2, kind: input, shape index: {}]   ;;  %s2702_s3 = inlined_call_operand.hbm [shape: bf16[256,128], index: 3, kind: input, shape index: {}]   ;;  %s2703_s4 = inlined_call_operand.vmem [shape: f32[1,128], index: 4, kind: input, shape index: {}]   ;;  %s2704_s5 = inlined_call_operand.hbm [shape: bf16[128,256], index: 5, kind: input, shape index: {}]   ;;  %s2705_s6 = inlined_call_operand.vmem [shape: f32[1,256], index: 6, kind: input, shape index: {}]   ;;  %s2706_s7 = inlined_call_operand.hbm [shape: bf16[256,128], index: 7, kind: input, shape index: {}]   ;;  %s2707_s8 = inlined_call_operand.vmem [shape: f32[1,128], index: 8, kind: input, shape index: {}]   ;;  %s2708_s9 = inlined_call_operand.hbm [shape: bf16[8,128], index: 9, kind: output, shape index: {}]  }
   0x1   :  { %15 = vsyncpa [#allocation6], 0 }
   0x2   :  { %16 = vsyncpa [#allocation9], 0 }
   0x3   :  { %17 = vsyncpa [#allocation4], 0  ;;  %s2542_s30 = smov [#allocation5]   ;;  %s2402_s13 = scalar_lea.hbm %s2700_s1, 20480 }
   0x4   :  { %s33_s10 = sshll.u32 %s2542_s30, 4  ;;  %p2403_p0 = scmp.ne.s32.totalorder %s2700_s1, %s2402_s13  ;;  %s34_s10 = int_to_ptr.vmem [resolvable:$true] %s33_s10 }
   0x5   :  { %p2406_p1 = scmp.lt.u32.totalorder %s2402_s13, %s2700_s1 }
   0x7   :  { %p2408_p2 = pnand %p2406_p1, %p2403_p0 }
   0x9   :  { %2411 = shalt.err (!%p2408_p2)
}
   0xa   :  { %s2412_s18 = scalar_lea.vmem %s34_s10, 20480  ;;  %p2417_p4 = scmp.lt.s32.totalorder %s34_s10, %s34_s10 }
   0xb   :  { %p2413_p3 = scmp.ne.s32.totalorder %s34_s10, %s2412_s18  ;;  %p2418_p5 = scmp.lt.s32.totalorder %s2412_s18, %s2412_s18 }
   0xd   :  { %p2419_p6 = por %p2418_p5, %p2417_p4 }
   0xf   :  { %p2420_p7 = pnand %p2419_p6, %p2413_p3 }
  0x11   :  { %2423 = shalt.err (!%p2420_p7)
}
  0x12   :  { %s2543_s19 = smov 128   ;;  %s2544_s20 = smov 8  }
  0x13   :  { %39 = dma.hbm_to_vmem [thread:$0]  %s2700_s1, 20480, %s34_s10, [#allocation6], %s2543_s19, %s2543_s19, %s2544_s20  }
  0x14   :  { %s2545_s23 = smov [#allocation8]   ;;  %s2546_s25 = smov [#allocation2]  }
  0x15   :  { %s61_s24 = sshll.u32 %s2545_s23, 4  ;;  %s24_s26 = sshll.u32 %s2546_s25, 4  ;;  %s62_s24 = int_to_ptr.vmem [resolvable:$true] %s61_s24  ;;  %s25_s26 = int_to_ptr.vmem [resolvable:$true] %s24_s26 }
  0x16   :  { %s2424_s29 = scalar_lea.hbm %s2704_s5, 2048 }
  0x17   :  { %p2425_p8 = scmp.ne.s32.totalorder %s2704_s5, %s2424_s29  ;;  %p2428_p9 = scmp.lt.u32.totalorder %s2424_s29, %s2704_s5 }
  0x19   :  { %p2430_p10 = pnand %p2428_p9, %p2425_p8 }
  0x1b   :  { %2433 = shalt.err (!%p2430_p10)
}
  0x1c   :  { %s2434_s1 = scalar_lea.vmem %s62_s24, 2048  ;;  %p2439_p12 = scmp.lt.s32.totalorder %s62_s24, %s62_s24 }
  0x1d   :  { %p2435_p11 = scmp.ne.s32.totalorder %s62_s24, %s2434_s1  ;;  %p2440_p13 = scmp.lt.s32.totalorder %s2434_s1, %s2434_s1 }
  0x1f   :  { %p2441_p0 = por %p2440_p13, %p2439_p12 }
  0x21   :  { %p2442_p1 = pnand %p2441_p0, %p2435_p11 }
  0x23   :  { %2445 = shalt.err (!%p2442_p1)
}
  0x24   :  { %67 = dma.hbm_to_vmem [thread:$0]  %s2704_s5, 2048, %s62_s24, [#allocation9], %s2543_s19, %s2543_s19, %s2544_s20  }
  0x25   :  { %s2446_s17 = scalar_lea.hbm %s2699_s0, 1280 }
  0x26   :  { %p2447_p2 = scmp.ne.s32.totalorder %s2699_s0, %s2446_s17  ;;  %p2450_p3 = scmp.lt.u32.totalorder %s2446_s17, %s2699_s0 }
  0x28   :  { %p2452_p4 = pnand %p2450_p3, %p2447_p2 }
  0x2a   :  { %2455 = shalt.err (!%p2452_p4)
}
  0x2b   :  { %s2456_s25 = scalar_lea.vmem %s25_s26, 1280  ;;  %p2461_p6 = scmp.lt.s32.totalorder %s25_s26, %s25_s26 }
  0x2c   :  { %p2457_p5 = scmp.ne.s32.totalorder %s25_s26, %s2456_s25  ;;  %p2462_p7 = scmp.lt.s32.totalorder %s2456_s25, %s2456_s25 }
  0x2e   :  { %p2463_p8 = por %p2462_p7, %p2461_p6 }
  0x30   :  { %p2464_p9 = pnand %p2463_p8, %p2457_p5 }
  0x32   :  { %2467 = shalt.err (!%p2464_p9)
}
  0x33   :  { %27 = dma.hbm_to_vmem [thread:$0]  %s2699_s0, 1280, %s25_s26, [#allocation3]  }
  0x34   :  { %s2547_s20 = smov [#allocation7]   ;;  %s2468_s29 = scalar_lea.hbm %s2702_s3, 2048 }
  0x35   :  { %s47_s24 = sshll.u32 %s2547_s20, 4  ;;  %p2469_p10 = scmp.ne.s32.totalorder %s2702_s3, %s2468_s29  ;;  %s48_s24 = int_to_ptr.vmem [resolvable:$true] %s47_s24 }
  0x36   :  { %p2472_p11 = scmp.lt.u32.totalorder %s2468_s29, %s2702_s3 }
  0x38   :  { %p2474_p12 = pnand %p2472_p11, %p2469_p10 }
  0x3a   :  { %2477 = shalt.err (!%p2474_p12)
}
  0x3b   :  { %s2478_s1 = scalar_lea.vmem %s48_s24, 2048  ;;  %p2483_p0 = scmp.lt.s32.totalorder %s48_s24, %s48_s24 }
  0x3c   :  { %p2479_p13 = scmp.ne.s32.totalorder %s48_s24, %s2478_s1  ;;  %p2484_p1 = scmp.lt.s32.totalorder %s2478_s1, %s2478_s1 }
  0x3e   :  { %p2485_p2 = por %p2484_p1, %p2483_p0 }
  0x40   :  { %p2486_p3 = pnand %p2485_p2, %p2479_p13 }
  0x42   :  { %2489 = shalt.err (!%p2486_p3)
}
  0x43   :  { %s2548_s0 = smov 64   ;;  %s2549_s26 = smov 4  }
  0x44   :  { %53 = dma.hbm_to_vmem [thread:$0]  %s2702_s3, 2048, %s48_s24, [#allocation6], %s2548_s0, %s2548_s0, %s2549_s26  }
  0x45   :  { %s2550_s15 = smov [#allocation10]   ;;  %s2490_s21 = scalar_lea.hbm %s2706_s7, 2048 }
  0x46   :  { %s75_s16 = sshll.u32 %s2550_s15, 4  ;;  %p2491_p4 = scmp.ne.s32.totalorder %s2706_s7, %s2490_s21  ;;  %s76_s16 = int_to_ptr.vmem [resolvable:$true] %s75_s16 }
  0x47   :  { %p2494_p5 = scmp.lt.u32.totalorder %s2490_s21, %s2706_s7 }
  0x49   :  { %p2496_p6 = pnand %p2494_p5, %p2491_p4 }
  0x4b   :  { %2499 = shalt.err (!%p2496_p6)
}
  0x4c   :  { %s2500_s19 = scalar_lea.vmem %s76_s16, 2048  ;;  %p2505_p8 = scmp.lt.s32.totalorder %s76_s16, %s76_s16 }
  0x4d   :  { %p2501_p7 = scmp.ne.s32.totalorder %s76_s16, %s2500_s19  ;;  %p2506_p9 = scmp.lt.s32.totalorder %s2500_s19, %s2500_s19 }
  0x4f   :  { %p2507_p10 = por %p2506_p9, %p2505_p8 }
  0x51   :  { %p2508_p11 = pnand %p2507_p10, %p2501_p7 }
  0x53   :  { %2511 = shalt.err (!%p2508_p11)
}
  0x54   :  { %81 = dma.hbm_to_vmem [thread:$0]  %s2706_s7, 2048, %s76_s16, [#allocation9], %s2548_s0, %s2548_s0, %s2549_s26  }
  0x55   :  { %2534 = dma.done.wait [#allocation3], 1280  }
  0x56   :  { %2535 = vsyncadd [#allocation3], 4294966016 }
  0x57   :  { %2536 = dma.done.wait [#allocation6], 22528  }
  0x58   :  { %2537 = vsyncadd [#allocation6], 4294944768 }
  0x59   :  { %2538 = dma.done.wait [#allocation9], 4096  }
  0x5a   :  { %2539 = vsyncadd [#allocation9], 4294963200  ;;  %v2106_v0 = vld [vmem:[#allocation5 + $0x4] ss:$8 sps:$4 sm:$0xff]   ;;  %v2110_v2 = vld [vmem:[#allocation5] ss:$8 sps:$4 sm:$0xff]  }
  0x5b   :  { %v2108_v1 = vld [vmem:[#allocation5 + $0x204] ss:$8 sps:$4 sm:$0xff]   ;;  %1092 = vmatprep.subr.bf16.mxu1 %v2106_v0  ;;  %v2111_v3 = vld [vmem:[#allocation5 + $0x200] ss:$8 sps:$4 sm:$0xff]   ;;  %v2112_v4 = vld [vmem:[#allocation5 + $0x14] ss:$8 sps:$4 sm:$0xff]  }
  0x5c   :  { %1174 = vmatprep.subr.bf16.mxu0 %v2108_v1  ;;  %1093 = vmatpush1.bf16.msra.mxu1 %v2110_v2  ;;  %v2114_v5 = vld [vmem:[#allocation5 + $0x214] ss:$8 sps:$4 sm:$0xff]   ;;  %v2116_v6 = vld [vmem:[#allocation5 + $0x10] ss:$8 sps:$4 sm:$0xff]   ;;  %v2118_v8 = vld [vmem:[#allocation5 + $0x24] ss:$8 sps:$4 sm:$0xff]  }
  0x5d   :  { %1175 = vmatpush1.bf16.msra.mxu0 %v2111_v3  ;;  %1094 = vmatprep.subr.bf16.mxu1 %v2112_v4  ;;  %v2117_v7 = vld [vmem:[#allocation5 + $0x210] ss:$8 sps:$4 sm:$0xff]   ;;  %v2120_v9 = vld [vmem:[#allocation5 + $0x224] ss:$8 sps:$4 sm:$0xff]   ;;  %v2122_v10 = vld [vmem:[#allocation5 + $0x20] ss:$8 sps:$4 sm:$0xff]  }
  0x5e   :  { %1176 = vmatprep.subr.bf16.mxu0 %v2114_v5  ;;  %v2123_v11 = vld [vmem:[#allocation5 + $0x220] ss:$8 sps:$4 sm:$0xff]   ;;  %v2124_v12 = vld [vmem:[#allocation5 + $0x34] ss:$8 sps:$4 sm:$0xff]   ;;  %v2128_v14 = vld [vmem:[#allocation5 + $0x30] ss:$8 sps:$4 sm:$0xff]  }
  0x5f   :  { %v2126_v13 = vld [vmem:[#allocation5 + $0x234] ss:$8 sps:$4 sm:$0xff]   ;;  %v2129_v15 = vld [vmem:[#allocation5 + $0x230] ss:$8 sps:$4 sm:$0xff]   ;;  %v2130_v16 = vld [vmem:[#allocation5 + $0x44] ss:$8 sps:$4 sm:$0xff]  }
  0x60   :  { %1095 = vmatpush1.bf16.msra.mxu1 %v2116_v6  ;;  %v2132_v17 = vld [vmem:[#allocation5 + $0x244] ss:$8 sps:$4 sm:$0xff]   ;;  %v2134_v18 = vld [vmem:[#allocation5 + $0x40] ss:$8 sps:$4 sm:$0xff]   ;;  %v2136_v20 = vld [vmem:[#allocation5 + $0x54] ss:$8 sps:$4 sm:$0xff]  }
  0x61   :  { %1177 = vmatpush1.bf16.msra.mxu0 %v2117_v7  ;;  %1096 = vmatprep.subr.bf16.mxu1 %v2118_v8  ;;  %v2135_v19 = vld [vmem:[#allocation5 + $0x240] ss:$8 sps:$4 sm:$0xff]   ;;  %v2138_v21 = vld [vmem:[#allocation5 + $0x254] ss:$8 sps:$4 sm:$0xff]   ;;  %v2140_v22 = vld [vmem:[#allocation5 + $0x50] ss:$8 sps:$4 sm:$0xff]  }
  0x62   :  { %1178 = vmatprep.subr.bf16.mxu0 %v2120_v9  ;;  %v2141_v23 = vld [vmem:[#allocation5 + $0x250] ss:$8 sps:$4 sm:$0xff]   ;;  %v2142_v24 = vld [vmem:[#allocation5 + $0x64] ss:$8 sps:$4 sm:$0xff]   ;;  %v2146_v26 = vld [vmem:[#allocation5 + $0x60] ss:$8 sps:$4 sm:$0xff]  }
  0x63   :  { %v2144_v25 = vld [vmem:[#allocation5 + $0x264] ss:$8 sps:$4 sm:$0xff]   ;;  %v2147_v27 = vld [vmem:[#allocation5 + $0x260] ss:$8 sps:$4 sm:$0xff]   ;;  %v2148_v28 = vld [vmem:[#allocation5 + $0x74] ss:$8 sps:$4 sm:$0xff]  }
  0x64   :  { %1097 = vmatpush1.bf16.msra.mxu1 %v2122_v10  ;;  %v2150_v29 = vld [vmem:[#allocation5 + $0x274] ss:$8 sps:$4 sm:$0xff]   ;;  %v2152_v30 = vld [vmem:[#allocation5 + $0x70] ss:$8 sps:$4 sm:$0xff]   ;;  %v2154_v32 = vld [vmem:[#allocation5 + $0x84] ss:$8 sps:$4 sm:$0xff]  }
  0x65   :  { %1179 = vmatpush1.bf16.msra.mxu0 %v2123_v11  ;;  %1098 = vmatprep.subr.bf16.mxu1 %v2124_v12  ;;  %v2153_v31 = vld [vmem:[#allocation5 + $0x270] ss:$8 sps:$4 sm:$0xff]   ;;  %v2156_v33 = vld [vmem:[#allocation5 + $0x284] ss:$8 sps:$4 sm:$0xff]   ;;  %v2158_v34 = vld [vmem:[#allocation5 + $0x80] ss:$8 sps:$4 sm:$0xff]  }
  0x66   :  { %1180 = vmatprep.subr.bf16.mxu0 %v2126_v13  ;;  %v2159_v35 = vld [vmem:[#allocation5 + $0x280] ss:$8 sps:$4 sm:$0xff]   ;;  %v2160_v36 = vld [vmem:[#allocation5 + $0x94] ss:$8 sps:$4 sm:$0xff]   ;;  %v2164_v38 = vld [vmem:[#allocation5 + $0x90] ss:$8 sps:$4 sm:$0xff]  }
  0x67   :  { %v2162_v37 = vld [vmem:[#allocation5 + $0x294] ss:$8 sps:$4 sm:$0xff]   ;;  %v2165_v39 = vld [vmem:[#allocation5 + $0x290] ss:$8 sps:$4 sm:$0xff]   ;;  %v2166_v40 = vld [vmem:[#allocation5 + $0xa4] ss:$8 sps:$4 sm:$0xff]  }
  0x68   :  { %1099 = vmatpush1.bf16.msra.mxu1 %v2128_v14  ;;  %v2168_v41 = vld [vmem:[#allocation5 + $0x2a4] ss:$8 sps:$4 sm:$0xff]   ;;  %v2170_v42 = vld [vmem:[#allocation5 + $0xa0] ss:$8 sps:$4 sm:$0xff]   ;;  %v2172_v44 = vld [vmem:[#allocation5 + $0xb4] ss:$8 sps:$4 sm:$0xff]  }
  0x69   :  { %1181 = vmatpush1.bf16.msra.mxu0 %v2129_v15  ;;  %1100 = vmatprep.subr.bf16.mxu1 %v2130_v16  ;;  %v2171_v43 = vld [vmem:[#allocation5 + $0x2a0] ss:$8 sps:$4 sm:$0xff]   ;;  %v2174_v45 = vld [vmem:[#allocation5 + $0x2b4] ss:$8 sps:$4 sm:$0xff]   ;;  %v2176_v47 = vld [vmem:[#allocation5 + $0xb0] ss:$8 sps:$4 sm:$0xff]  }
  0x6a   :  { %1182 = vmatprep.subr.bf16.mxu0 %v2132_v17  ;;  %v101_v46 = vld [vmem:[#allocation2 + $0x8] sm:$0xff]  ;;  %v2178_v51 = vld [vmem:[#allocation5 + $0xc4] ss:$8 sps:$4 sm:$0xff]   ;;  %v2182_v54 = vld [vmem:[#allocation5 + $0xc0] ss:$8 sps:$4 sm:$0xff]   ;;  %s2552_s30 = smov [#allocation11]  }
  0x6b   :  { %v111_v48 = vpack.c.bf16 %v101_v46, %v101_v46  ;;  %v2177_v49 = vld [vmem:[#allocation5 + $0x2b0] ss:$8 sps:$4 sm:$0xff]   ;;  %v2180_v52 = vld [vmem:[#allocation5 + $0x2c4] ss:$8 sps:$4 sm:$0xff]   ;;  %v2183_v55 = vld [vmem:[#allocation5 + $0x2c0] ss:$8 sps:$4 sm:$0xff]  }
  0x6c   :  { %1101 = vmatpush1.bf16.msra.mxu1 %v2134_v18  ;;  %v105_v50 = vld [vmem:[#allocation2 + $0x28] sm:$0xff]  ;;  %v2190_v60 = vld [vmem:[#allocation5 + $0xe4] ss:$8 sps:$4 sm:$0xff]   ;;  %v2194_v62 = vld [vmem:[#allocation5 + $0xe0] ss:$8 sps:$4 sm:$0xff]   ;;  %s1814_s11 = sshll.u32 %s2552_s30, 4  ;;  %s1815_s11 = int_to_ptr.vmem [resolvable:$true] %s1814_s11 }
  0x6d   :  { %1183 = vmatpush1.bf16.msra.mxu0 %v2135_v19  ;;  %1102 = vmatprep.subr.bf16.mxu1 %v2136_v20  ;;  %v115_v53 = vpack.c.bf16 %v105_v50, %v105_v50  ;;  %v2184_v56 = vld [vmem:[#allocation5 + $0xd4] ss:$8 sps:$4 sm:$0xff]   ;;  %v2188_v58 = vld [vmem:[#allocation5 + $0xd0] ss:$8 sps:$4 sm:$0xff]   ;;  %v2192_v61 = vld [vmem:[#allocation5 + $0x2e4] ss:$8 sps:$4 sm:$0xff]   ;;  %p2517_p13 = scmp.lt.s32.totalorder %s1815_s11, %s1815_s11 }
  0x6e   :  { %1184 = vmatprep.subr.bf16.mxu0 %v2138_v21  ;;  %1124 = vmatprep.mubr.bf16.mxu1 %v111_v48  ;;  %v2186_v57 = vld [vmem:[#allocation5 + $0x2d4] ss:$8 sps:$4 sm:$0xff]   ;;  %v2189_v59 = vld [vmem:[#allocation5 + $0x2d0] ss:$8 sps:$4 sm:$0xff]   ;;  %v2195_v63 = vld [vmem:[#allocation5 + $0x2e0] ss:$8 sps:$4 sm:$0xff]  }
  0x6f   :  { %1206 = vmatprep.mubr.bf16.mxu0 %v115_v53  ;;  %v2196_v0 = vld [vmem:[#allocation5 + $0xf4] ss:$8 sps:$4 sm:$0xff]   ;;  %v2200_v2 = vld [vmem:[#allocation5 + $0xf0] ss:$8 sps:$4 sm:$0xff]   ;;  %v2204_v4 = vld [vmem:[#allocation5 + $0x104] ss:$8 sps:$4 sm:$0xff]  }
  0x70   :  { %1103 = vmatpush1.bf16.msra.mxu1 %v2140_v22  ;;  %v2198_v1 = vld [vmem:[#allocation5 + $0x2f4] ss:$8 sps:$4 sm:$0xff]   ;;  %v2201_v3 = vld [vmem:[#allocation5 + $0x2f0] ss:$8 sps:$4 sm:$0xff]   ;;  %v2207_v7 = vld [vmem:[#allocation5 + $0x304] ss:$8 sps:$4 sm:$0xff]  }
  0x71   :  { %1185 = vmatpush1.bf16.msra.mxu0 %v2141_v23  ;;  %1104 = vmatprep.subr.bf16.mxu1 %v2142_v24  ;;  %v100_v5 = vld [vmem:[#allocation2] sm:$0xff]  ;;  %v2202_v8 = vld [vmem:[#allocation5 + $0x100] ss:$8 sps:$4 sm:$0xff]   ;;  %v2216_v16 = vld [vmem:[#allocation5 + $0x124] ss:$8 sps:$4 sm:$0xff]   ;;  %s2512_s12 = scalar_lea.vmem %s1815_s11, 64 }
  0x72   :  { %1186 = vmatprep.subr.bf16.mxu0 %v2144_v25  ;;  %v104_v6 = vld [vmem:[#allocation2 + $0x20] sm:$0xff]  ;;  %v2205_v9 = vld [vmem:[#allocation5 + $0x300] ss:$8 sps:$4 sm:$0xff]   ;;  %v110_v10 = vpack.c.bf16 %v100_v5, %v100_v5  ;;  %v2219_v17 = vld [vmem:[#allocation5 + $0x324] ss:$8 sps:$4 sm:$0xff]   ;;  %p2513_p12 = scmp.ne.s32.totalorder %s1815_s11, %s2512_s12  ;;  %p2518_p0 = scmp.lt.s32.totalorder %s2512_s12, %s2512_s12 }
  0x73   :  { %v114_v11 = vpack.c.bf16 %v104_v6, %v104_v6  ;;  %v2210_v12 = vld [vmem:[#allocation5 + $0x114] ss:$8 sps:$4 sm:$0xff]   ;;  %v2208_v14 = vld [vmem:[#allocation5 + $0x110] ss:$8 sps:$4 sm:$0xff]   ;;  %v2214_v18 = vld [vmem:[#allocation5 + $0x120] ss:$8 sps:$4 sm:$0xff]  }
  0x74   :  { %1105 = vmatpush1.bf16.msra.mxu1 %v2146_v26  ;;  %v2213_v13 = vld [vmem:[#allocation5 + $0x314] ss:$8 sps:$4 sm:$0xff]   ;;  %v2211_v15 = vld [vmem:[#allocation5 + $0x310] ss:$8 sps:$4 sm:$0xff]   ;;  %v2217_v19 = vld [vmem:[#allocation5 + $0x320] ss:$8 sps:$4 sm:$0xff]   ;;  %p2519_p1 = por %p2518_p0, %p2517_p13 }
  0x75   :  { %1187 = vmatpush1.bf16.msra.mxu0 %v2147_v27  ;;  %1106 = vmatprep.subr.bf16.mxu1 %v2148_v28  ;;  %v2222_v20 = vld [vmem:[#allocation5 + $0x134] ss:$8 sps:$4 sm:$0xff]   ;;  %v2220_v22 = vld [vmem:[#allocation5 + $0x130] ss:$8 sps:$4 sm:$0xff]   ;;  %v2228_v24 = vld [vmem:[#allocation5 + $0x144] ss:$8 sps:$4 sm:$0xff]  }
  0x76   :  { %1188 = vmatprep.subr.bf16.mxu0 %v2150_v29  ;;  %v2225_v21 = vld [vmem:[#allocation5 + $0x334] ss:$8 sps:$4 sm:$0xff]   ;;  %v2223_v23 = vld [vmem:[#allocation5 + $0x330] ss:$8 sps:$4 sm:$0xff]   ;;  %v2231_v25 = vld [vmem:[#allocation5 + $0x344] ss:$8 sps:$4 sm:$0xff]   ;;  %p2520_p2 = pnand %p2519_p1, %p2513_p12 }
  0x77   :  { %v2226_v26 = vld [vmem:[#allocation5 + $0x140] ss:$8 sps:$4 sm:$0xff]   ;;  %v2234_v28 = vld [vmem:[#allocation5 + $0x154] ss:$8 sps:$4 sm:$0xff]   ;;  %v2256_v50 = vld [vmem:[#allocation5 + $0x190] ss:$8 sps:$4 sm:$0xff]  }
  0x78   :  { %1107 = vmatpush1.bf16.msra.mxu1 %v2152_v30  ;;  %v2229_v27 = vld [vmem:[#allocation5 + $0x340] ss:$8 sps:$4 sm:$0xff]   ;;  %v2237_v29 = vld [vmem:[#allocation5 + $0x354] ss:$8 sps:$4 sm:$0xff]   ;;  %v2232_v30 = vld [vmem:[#allocation5 + $0x150] ss:$8 sps:$4 sm:$0xff]  }
  0x79   :  { %1189 = vmatpush1.bf16.msra.mxu0 %v2153_v31  ;;  %1108 = vmatprep.subr.bf16.mxu1 %v2154_v32  ;;  %v2235_v31 = vld [vmem:[#allocation5 + $0x350] ss:$8 sps:$4 sm:$0xff]   ;;  %v2240_v32 = vld [vmem:[#allocation5 + $0x164] ss:$8 sps:$4 sm:$0xff]   ;;  %v2250_v46 = vld [vmem:[#allocation5 + $0x180] ss:$8 sps:$4 sm:$0xff]  }
  0x7a   :  { %1190 = vmatprep.subr.bf16.mxu0 %v2156_v33  ;;  %v2243_v33 = vld [vmem:[#allocation5 + $0x364] ss:$8 sps:$4 sm:$0xff]   ;;  %v2258_v48 = vld [vmem:[#allocation5 + $0x194] ss:$8 sps:$4 sm:$0xff]   ;;  %v2286_v6 = vld [vmem:[#allocation5 + $0x1e0] ss:$8 sps:$4 sm:$0xff]  }
  0x7b   :  { %v2267_v53 = vld [vmem:[#allocation5 + $0x3a4] ss:$8 sps:$4 sm:$0xff]  }
  0x7c   :  { %1109 = vmatpush1.bf16.msra.mxu1 %v2158_v34  ;;  %v103_v34 = vld [vmem:[#allocation2 + $0x18] sm:$0xff] }
  0x7d   :  { %1191 = vmatpush1.bf16.msra.mxu0 %v2159_v35  ;;  %1110 = vmatprep.subr.bf16.mxu1 %v2160_v36  ;;  %v2238_v35 = vld [vmem:[#allocation5 + $0x160] ss:$8 sps:$4 sm:$0xff]   ;;  %v113_v36 = vpack.c.bf16 %v103_v34, %v103_v34  ;;  %v2291_v5 = vld [vmem:[#allocation5 + $0x3e4] ss:$8 sps:$4 sm:$0xff]  }
  0x7e   :  { %1192 = vmatprep.subr.bf16.mxu0 %v2162_v37  ;;  %v107_v37 = vld [vmem:[#allocation2 + $0x38] sm:$0xff] }
  0x7f   :  { %v2324_v34 = vld [vmem:[#allocation5 + $0x484] ss:$8 sps:$4 sm:$0xff]  }
  0x80   :  { %1111 = vmatpush1.bf16.msra.mxu1 %v2164_v38  ;;  %v2241_v38 = vld [vmem:[#allocation5 + $0x360] ss:$8 sps:$4 sm:$0xff]  }
  0x81   :  { %1193 = vmatpush1.bf16.msra.mxu0 %v2165_v39  ;;  %1112 = vmatprep.subr.bf16.mxu1 %v2166_v40  ;;  %v2246_v39 = vld [vmem:[#allocation5 + $0x174] ss:$8 sps:$4 sm:$0xff]   ;;  %v117_v40 = vpack.c.bf16 %v107_v37, %v107_v37  ;;  %v2325_v37 = vld [vmem:[#allocation5 + $0x490] ss:$8 sps:$4 sm:$0xff]  }
  0x82   :  { %1194 = vmatprep.subr.bf16.mxu0 %v2168_v41  ;;  %v2249_v41 = vld [vmem:[#allocation5 + $0x374] ss:$8 sps:$4 sm:$0xff]  }
  0x84   :  { %1113 = vmatpush1.bf16.msra.mxu1 %v2170_v42  ;;  %v2244_v42 = vld [vmem:[#allocation5 + $0x170] ss:$8 sps:$4 sm:$0xff]  }
  0x85   :  { %1195 = vmatpush1.bf16.msra.mxu0 %v2171_v43  ;;  %1114 = vmatprep.subr.bf16.mxu1 %v2172_v44  ;;  %v2247_v43 = vld [vmem:[#allocation5 + $0x370] ss:$8 sps:$4 sm:$0xff]   ;;  %v2252_v44 = vld [vmem:[#allocation5 + $0x184] ss:$8 sps:$4 sm:$0xff]  }
  0x86   :  { %1196 = vmatprep.subr.bf16.mxu0 %v2174_v45  ;;  %v2255_v45 = vld [vmem:[#allocation5 + $0x384] ss:$8 sps:$4 sm:$0xff]  }
  0x88   :  { %1115 = vmatpush1.bf16.msra.mxu1 %v2176_v47  ;;  %v2253_v47 = vld [vmem:[#allocation5 + $0x380] ss:$8 sps:$4 sm:$0xff]  }
  0x89   :  { %1197 = vmatpush1.bf16.msra.mxu0 %v2177_v49  ;;  %1116 = vmatprep.subr.bf16.mxu1 %v2178_v51  ;;  %v2261_v49 = vld [vmem:[#allocation5 + $0x394] ss:$8 sps:$4 sm:$0xff]   ;;  %v2259_v51 = vld [vmem:[#allocation5 + $0x390] ss:$8 sps:$4 sm:$0xff]  }
  0x8a   :  { %1198 = vmatprep.subr.bf16.mxu0 %v2180_v52  ;;  %v2264_v52 = vld [vmem:[#allocation5 + $0x1a4] ss:$8 sps:$4 sm:$0xff]  }
  0x8c   :  { %1117 = vmatpush1.bf16.msra.mxu1 %v2182_v54  ;;  %v2262_v54 = vld [vmem:[#allocation5 + $0x1a0] ss:$8 sps:$4 sm:$0xff]  }
  0x8d   :  { %1199 = vmatpush1.bf16.msra.mxu0 %v2183_v55  ;;  %1118 = vmatprep.subr.bf16.mxu1 %v2184_v56  ;;  %v2265_v55 = vld [vmem:[#allocation5 + $0x3a0] ss:$8 sps:$4 sm:$0xff]   ;;  %v2270_v56 = vld [vmem:[#allocation5 + $0x1b4] ss:$8 sps:$4 sm:$0xff]  }
  0x8e   :  { %1200 = vmatprep.subr.bf16.mxu0 %v2186_v57  ;;  %v2273_v57 = vld [vmem:[#allocation5 + $0x3b4] ss:$8 sps:$4 sm:$0xff]  }
  0x90   :  { %1119 = vmatpush1.bf16.msra.mxu1 %v2188_v58  ;;  %v2268_v58 = vld [vmem:[#allocation5 + $0x1b0] ss:$8 sps:$4 sm:$0xff]  }
  0x91   :  { %1201 = vmatpush1.bf16.msra.mxu0 %v2189_v59  ;;  %1120 = vmatprep.subr.bf16.mxu1 %v2190_v60  ;;  %v2271_v59 = vld [vmem:[#allocation5 + $0x3b0] ss:$8 sps:$4 sm:$0xff]   ;;  %v2276_v60 = vld [vmem:[#allocation5 + $0x1c4] ss:$8 sps:$4 sm:$0xff]  }
  0x92   :  { %1202 = vmatprep.subr.bf16.mxu0 %v2192_v61  ;;  %v2279_v61 = vld [vmem:[#allocation5 + $0x3c4] ss:$8 sps:$4 sm:$0xff]  }
  0x94   :  { %1121 = vmatpush1.bf16.msra.mxu1 %v2194_v62  ;;  %v2274_v62 = vld [vmem:[#allocation5 + $0x1c0] ss:$8 sps:$4 sm:$0xff]  }
  0x95   :  { %1203 = vmatpush1.bf16.msra.mxu0 %v2195_v63  ;;  %1122 = vmatprep.subr.bf16.mxu1 %v2196_v0  ;;  %v2277_v63 = vld [vmem:[#allocation5 + $0x3c0] ss:$8 sps:$4 sm:$0xff]   ;;  %v2282_v0 = vld [vmem:[#allocation5 + $0x1d4] ss:$8 sps:$4 sm:$0xff]  }
  0x96   :  { %1204 = vmatprep.subr.bf16.mxu0 %v2198_v1  ;;  %v2285_v1 = vld [vmem:[#allocation5 + $0x3d4] ss:$8 sps:$4 sm:$0xff]  }
  0x98   :  { %1123 = vmatpush1.bf16.msra.mxu1 %v2200_v2  ;;  %v2280_v2 = vld [vmem:[#allocation5 + $0x1d0] ss:$8 sps:$4 sm:$0xff]  }
  0x99   :  { %1205 = vmatpush1.bf16.msra.mxu0 %v2201_v3  ;;  %1133 = vmatprep.subr.bf16.mxu1 %v2204_v4  ;;  %v2283_v3 = vld [vmem:[#allocation5 + $0x3d0] ss:$8 sps:$4 sm:$0xff]   ;;  %v2288_v4 = vld [vmem:[#allocation5 + $0x1e4] ss:$8 sps:$4 sm:$0xff]  }
  0x9a   :  { %1215 = vmatprep.subr.bf16.mxu0 %v2207_v7  ;;  %v2289_v7 = vld [vmem:[#allocation5 + $0x3e0] ss:$8 sps:$4 sm:$0xff]  }
  0x9b   :  { %1125 = vmatmul.mubr.bf16.vlgmr.msra.gmra.mrb[0].mxu1 %v110_v10  ;;  %v2292_v10 = vld [vmem:[#allocation5 + $0x1f0] ss:$8 sps:$4 sm:$0xff]  }
  0x9c   :  { %1207 = vmatmul.mubr.bf16.vlgmr.msra.gmra.mrb[0].mxu0 %v114_v11  ;;  %1134 = vmatpush1.bf16.msra.mxu1 %v2202_v8  ;;  %v2294_v8 = vld [vmem:[#allocation5 + $0x1f4] ss:$8 sps:$4 sm:$0xff]   ;;  %v2295_v11 = vld [vmem:[#allocation5 + $0x3f0] ss:$8 sps:$4 sm:$0xff]  }
  0x9d   :  { %1216 = vmatpush1.bf16.msra.mxu0 %v2205_v9  ;;  %1135 = vmatprep.subr.bf16.mxu1 %v2210_v12  ;;  %v2297_v9 = vld [vmem:[#allocation5 + $0x3f4] ss:$8 sps:$4 sm:$0xff]   ;;  %v102_v12 = vld [vmem:[#allocation2 + $0x10] sm:$0xff] }
  0x9e   :  { %1217 = vmatprep.subr.bf16.mxu0 %v2213_v13  ;;  %1165 = vmatprep.mubr.bf16.mxu1 %v113_v36  ;;  %v106_v13 = vld [vmem:[#allocation2 + $0x30] sm:$0xff]  ;;  %v2327_v36 = vld [vmem:[#allocation5 + $0x494] ss:$8 sps:$4 sm:$0xff]  }
  0x9f   :  { %1247 = vmatprep.mubr.bf16.mxu0 %v117_v40  ;;  %v2333_v40 = vld [vmem:[#allocation5 + $0x4b4] ss:$8 sps:$4 sm:$0xff]  }
  0xa0   :  { %1136 = vmatpush1.bf16.msra.mxu1 %v2208_v14  ;;  %v2300_v14 = vld [vmem:[#allocation5 + $0x404] ss:$8 sps:$4 sm:$0xff]  }
  0xa1   :  { %1218 = vmatpush1.bf16.msra.mxu0 %v2211_v15  ;;  %1137 = vmatprep.subr.bf16.mxu1 %v2216_v16  ;;  %v109_v15 = vld [vmem:[#allocation2 + $0x48] sm:$0xff]  ;;  %v2298_v16 = vld [vmem:[#allocation5 + $0x400] ss:$8 sps:$4 sm:$0xff]  }
  0xa2   :  { %1219 = vmatprep.subr.bf16.mxu0 %v2219_v17  ;;  %v112_v17 = vpack.c.bf16 %v102_v12, %v102_v12  ;;  %v280_v12 = vld [vmem:[%s2701_s2] sm:$0x3] }
  0xa4   :  { %1138 = vmatpush1.bf16.msra.mxu1 %v2214_v18  ;;  %v116_v18 = vpack.c.bf16 %v106_v13, %v106_v13 }
  0xa5   :  { %1220 = vmatpush1.bf16.msra.mxu0 %v2217_v19  ;;  %1139 = vmatprep.subr.bf16.mxu1 %v2222_v20  ;;  %v2303_v19 = vld [vmem:[#allocation5 + $0x414] ss:$8 sps:$4 sm:$0xff]   ;;  %v119_v20 = vpack.c.bf16 %v109_v15, %v109_v15 }
  0xa6   :  { %1221 = vmatprep.subr.bf16.mxu0 %v2225_v21  ;;  %v2301_v21 = vld [vmem:[#allocation5 + $0x410] ss:$8 sps:$4 sm:$0xff]  }
  0xa8   :  { %1140 = vmatpush1.bf16.msra.mxu1 %v2220_v22  ;;  %v2306_v22 = vld [vmem:[#allocation5 + $0x424] ss:$8 sps:$4 sm:$0xff]  }
  0xa9   :  { %1222 = vmatpush1.bf16.msra.mxu0 %v2223_v23  ;;  %1141 = vmatprep.subr.bf16.mxu1 %v2228_v24  ;;  %v2304_v23 = vld [vmem:[#allocation5 + $0x420] ss:$8 sps:$4 sm:$0xff]   ;;  %v2309_v24 = vld [vmem:[#allocation5 + $0x434] ss:$8 sps:$4 sm:$0xff]  }
  0xaa   :  { %1223 = vmatprep.subr.bf16.mxu0 %v2231_v25  ;;  %v2307_v25 = vld [vmem:[#allocation5 + $0x430] ss:$8 sps:$4 sm:$0xff]  }
  0xac   :  { %1142 = vmatpush1.bf16.msra.mxu1 %v2226_v26  ;;  %v2312_v26 = vld [vmem:[#allocation5 + $0x444] ss:$8 sps:$4 sm:$0xff]  }
  0xad   :  { %1224 = vmatpush1.bf16.msra.mxu0 %v2229_v27  ;;  %1143 = vmatprep.subr.bf16.mxu1 %v2234_v28  ;;  %v2310_v27 = vld [vmem:[#allocation5 + $0x440] ss:$8 sps:$4 sm:$0xff]   ;;  %v2315_v28 = vld [vmem:[#allocation5 + $0x454] ss:$8 sps:$4 sm:$0xff]  }
  0xae   :  { %1225 = vmatprep.subr.bf16.mxu0 %v2237_v29  ;;  %v2313_v29 = vld [vmem:[#allocation5 + $0x450] ss:$8 sps:$4 sm:$0xff]  }
  0xb0   :  { %1144 = vmatpush1.bf16.msra.mxu1 %v2232_v30  ;;  %v2318_v30 = vld [vmem:[#allocation5 + $0x464] ss:$8 sps:$4 sm:$0xff]  }
  0xb1   :  { %1226 = vmatpush1.bf16.msra.mxu0 %v2235_v31  ;;  %1145 = vmatprep.subr.bf16.mxu1 %v2240_v32  ;;  %v2316_v31 = vld [vmem:[#allocation5 + $0x460] ss:$8 sps:$4 sm:$0xff]   ;;  %v2321_v32 = vld [vmem:[#allocation5 + $0x474] ss:$8 sps:$4 sm:$0xff]  }
  0xb2   :  { %1227 = vmatprep.subr.bf16.mxu0 %v2243_v33  ;;  %v2319_v33 = vld [vmem:[#allocation5 + $0x470] ss:$8 sps:$4 sm:$0xff]  }
  0xb4   :  { %1146 = vmatpush1.bf16.msra.mxu1 %v2238_v35  ;;  %v2322_v35 = vld [vmem:[#allocation5 + $0x480] ss:$8 sps:$4 sm:$0xff]  }
  0xb5   :  { %1228 = vmatpush1.bf16.msra.mxu0 %v2241_v38  ;;  %1147 = vmatprep.subr.bf16.mxu1 %v2246_v39  ;;  %v2330_v38 = vld [vmem:[#allocation5 + $0x4a4] ss:$8 sps:$4 sm:$0xff]   ;;  %v2328_v39 = vld [vmem:[#allocation5 + $0x4a0] ss:$8 sps:$4 sm:$0xff]  }
  0xb6   :  { %1229 = vmatprep.subr.bf16.mxu0 %v2249_v41  ;;  %v2331_v41 = vld [vmem:[#allocation5 + $0x4b0] ss:$8 sps:$4 sm:$0xff]  }
  0xb8   :  { %1148 = vmatpush1.bf16.msra.mxu1 %v2244_v42  ;;  %v2336_v42 = vld [vmem:[#allocation5 + $0x4c4] ss:$8 sps:$4 sm:$0xff]  }
  0xb9   :  { %1230 = vmatpush1.bf16.msra.mxu0 %v2247_v43  ;;  %1149 = vmatprep.subr.bf16.mxu1 %v2252_v44  ;;  %v2334_v43 = vld [vmem:[#allocation5 + $0x4c0] ss:$8 sps:$4 sm:$0xff]   ;;  %v2339_v44 = vld [vmem:[#allocation5 + $0x4d4] ss:$8 sps:$4 sm:$0xff]  }
  0xba   :  { %1231 = vmatprep.subr.bf16.mxu0 %v2255_v45  ;;  %v2337_v45 = vld [vmem:[#allocation5 + $0x4d0] ss:$8 sps:$4 sm:$0xff]  }
  0xbc   :  { %1150 = vmatpush1.bf16.msra.mxu1 %v2250_v46  ;;  %v2342_v46 = vld [vmem:[#allocation5 + $0x4e4] ss:$8 sps:$4 sm:$0xff]  }
  0xbd   :  { %1232 = vmatpush1.bf16.msra.mxu0 %v2253_v47  ;;  %1151 = vmatprep.subr.bf16.mxu1 %v2258_v48  ;;  %v2340_v47 = vld [vmem:[#allocation5 + $0x4e0] ss:$8 sps:$4 sm:$0xff]   ;;  %v2345_v48 = vld [vmem:[#allocation5 + $0x4f4] ss:$8 sps:$4 sm:$0xff]  }
  0xbe   :  { %1233 = vmatprep.subr.bf16.mxu0 %v2261_v49  ;;  %v2343_v49 = vld [vmem:[#allocation5 + $0x4f0] ss:$8 sps:$4 sm:$0xff]  }
  0xc0   :  { %1152 = vmatpush1.bf16.msra.mxu1 %v2256_v50  ;;  %v108_v50 = vld [vmem:[#allocation2 + $0x40] sm:$0xff] }
  0xc1   :  { %1234 = vmatpush1.bf16.msra.mxu0 %v2259_v51  ;;  %1153 = vmatprep.subr.bf16.mxu1 %v2264_v52  ;;  %v118_v51 = vpack.c.bf16 %v108_v50, %v108_v50  ;;  %v2346_v52 = vld [vmem:[#allocation7 + $0x40] sm:$0xff]  }
  0xc2   :  { %1235 = vmatprep.subr.bf16.mxu0 %v2267_v53  ;;  %v2347_v53 = vld [vmem:[#allocation7] sm:$0xff]  }
  0xc4   :  { %1154 = vmatpush1.bf16.msra.mxu1 %v2262_v54  ;;  %v2348_v54 = vld [vmem:[#allocation7 + $0x48] sm:$0xff]  }
  0xc5   :  { %1236 = vmatpush1.bf16.msra.mxu0 %v2265_v55  ;;  %1155 = vmatprep.subr.bf16.mxu1 %v2270_v56  ;;  %v2349_v55 = vld [vmem:[#allocation7 + $0x8] sm:$0xff]   ;;  %v2350_v56 = vld [vmem:[#allocation7 + $0x50] sm:$0xff]  }
  0xc6   :  { %1237 = vmatprep.subr.bf16.mxu0 %v2273_v57  ;;  %v2351_v57 = vld [vmem:[#allocation7 + $0x10] sm:$0xff]  }
  0xc8   :  { %1156 = vmatpush1.bf16.msra.mxu1 %v2268_v58  ;;  %v2352_v58 = vld [vmem:[#allocation7 + $0x58] sm:$0xff]  }
  0xc9   :  { %1238 = vmatpush1.bf16.msra.mxu0 %v2271_v59  ;;  %1157 = vmatprep.subr.bf16.mxu1 %v2276_v60  ;;  %v2353_v59 = vld [vmem:[#allocation7 + $0x18] sm:$0xff]   ;;  %v2354_v60 = vld [vmem:[#allocation7 + $0x60] sm:$0xff]  }
  0xca   :  { %1239 = vmatprep.subr.bf16.mxu0 %v2279_v61  ;;  %v2355_v61 = vld [vmem:[#allocation7 + $0x20] sm:$0xff]  }
  0xcc   :  { %1158 = vmatpush1.bf16.msra.mxu1 %v2274_v62  ;;  %v2356_v62 = vld [vmem:[#allocation7 + $0x68] sm:$0xff]  }
  0xcd   :  { %1240 = vmatpush1.bf16.msra.mxu0 %v2277_v63  ;;  %1159 = vmatprep.subr.bf16.mxu1 %v2282_v0  ;;  %v2357_v63 = vld [vmem:[#allocation7 + $0x28] sm:$0xff]   ;;  %v2358_v0 = vld [vmem:[#allocation7 + $0x70] sm:$0xff]  }
  0xce   :  { %1241 = vmatprep.subr.bf16.mxu0 %v2285_v1  ;;  %v2359_v1 = vld [vmem:[#allocation7 + $0x30] sm:$0xff]  }
  0xd0   :  { %1160 = vmatpush1.bf16.msra.mxu1 %v2280_v2  ;;  %v2360_v2 = vld [vmem:[#allocation7 + $0x78] sm:$0xff]  }
  0xd1   :  { %1242 = vmatpush1.bf16.msra.mxu0 %v2283_v3  ;;  %1161 = vmatprep.subr.bf16.mxu1 %v2288_v4  ;;  %v2361_v3 = vld [vmem:[#allocation7 + $0x38] sm:$0xff]   ;;  %v2364_v4 = vld [vmem:[#allocation8 + $0x4] ss:$8 sps:$4 sm:$0xff]  }
  0xd2   :  { %1243 = vmatprep.subr.bf16.mxu0 %v2291_v5 }
  0xd4   :  { %1162 = vmatpush1.bf16.msra.mxu1 %v2286_v6 }
  0xd5   :  { %1244 = vmatpush1.bf16.msra.mxu0 %v2289_v7  ;;  %1163 = vmatprep.subr.bf16.mxu1 %v2294_v8 }
  0xd6   :  { %1245 = vmatprep.subr.bf16.mxu0 %v2297_v9  ;;  %v282_v9 = vlaneseq }
  0xd8   :  { %1164 = vmatpush1.bf16.msra.mxu1 %v2292_v10  ;;  %v2663_v10 = vshrl.u32 %v282_v9, 7 }
  0xd9   :  { %1246 = vmatpush1.bf16.msra.mxu0 %v2295_v11  ;;  %2035 = vmatprep.subr.bf16.mxu1 %v2346_v52 }
  0xda   :  { %1256 = vmatprep.subr.bf16.mxu0 %v2300_v14  ;;  %v284_v11 = vsub.s32 0, %v2663_v10  ;;  %v288_v13 = vsub.s32 1, %v2663_v10 }
  0xdb   :  { %1166 = vmatmul.mubr.bf16.vlgmr.msra.gmra.mrb[0].mxu1 %v112_v17 }
  0xdc   :  { %1248 = vmatmul.mubr.bf16.vlgmr.msra.gmra.mrb[0].mxu0 %v116_v18  ;;  %2036 = vmatpush3.bf16.msra.mxu1 %v2347_v53  ;;  %v285_v14 = vrot.slane %v280_v12, %v284_v11  ;;  %v289_v15 = vrot.slane %v280_v12, %v288_v13  ;;  %v2387_v53 = vld [vmem:[#allocation10] sm:$0xff]  }
  0xdd   :  { %1257 = vmatpush1.bf16.msra.mxu0 %v2298_v16  ;;  %1288 = vmatprep.mubr.bf16.mxu0 %v119_v20 }
  0xde   :  { %1258 = vmatprep.subr.bf16.mxu0 %v2303_v19  ;;  %2037 = vmatprep.subr.bf16.mxu1 %v2348_v54 }
  0xe0   :  { %2038 = vmatpush3.bf16.msra.mxu1 %v2349_v55  ;;  %v2388_v55 = vld [vmem:[#allocation10 + $0x48] sm:$0xff]  }
  0xe1   :  { %1259 = vmatpush1.bf16.msra.mxu0 %v2301_v21  ;;  %2039 = vmatprep.subr.bf16.mxu1 %v2350_v56  ;;  %v2389_v56 = vld [vmem:[#allocation10 + $0x8] sm:$0xff]  }
  0xe2   :  { %1260 = vmatprep.subr.bf16.mxu0 %v2306_v22 }
  0xe4   :  { %2040 = vmatpush3.bf16.msra.mxu1 %v2351_v57  ;;  %v2390_v57 = vld [vmem:[#allocation10 + $0x50] sm:$0xff]  }
  0xe5   :  { %1261 = vmatpush1.bf16.msra.mxu0 %v2304_v23  ;;  %2041 = vmatprep.subr.bf16.mxu1 %v2352_v58  ;;  %v2391_v58 = vld [vmem:[#allocation10 + $0x10] sm:$0xff]  }
  0xe6   :  { %1262 = vmatprep.subr.bf16.mxu0 %v2309_v24 }
  0xe8   :  { %2042 = vmatpush3.bf16.msra.mxu1 %v2353_v59  ;;  %v2392_v59 = vld [vmem:[#allocation10 + $0x58] sm:$0xff]  }
  0xe9   :  { %1263 = vmatpush1.bf16.msra.mxu0 %v2307_v25  ;;  %2043 = vmatprep.subr.bf16.mxu1 %v2354_v60  ;;  %v2393_v60 = vld [vmem:[#allocation10 + $0x18] sm:$0xff]  }
  0xea   :  { %1264 = vmatprep.subr.bf16.mxu0 %v2312_v26 }
  0xec   :  { %2044 = vmatpush3.bf16.msra.mxu1 %v2355_v61  ;;  %v2394_v61 = vld [vmem:[#allocation10 + $0x60] sm:$0xff]  }
  0xed   :  { %1265 = vmatpush1.bf16.msra.mxu0 %v2310_v27  ;;  %2045 = vmatprep.subr.bf16.mxu1 %v2356_v62  ;;  %v2362_v27 = vld [vmem:[#allocation8] ss:$8 sps:$4 sm:$0xff]  }
  0xee   :  { %1266 = vmatprep.subr.bf16.mxu0 %v2315_v28  ;;  %v2395_v62 = vld [vmem:[#allocation10 + $0x20] sm:$0xff]  }
  0xf0   :  { %2046 = vmatpush3.bf16.msra.mxu1 %v2357_v63  ;;  %v2396_v63 = vld [vmem:[#allocation10 + $0x68] sm:$0xff]  }
  0xf1   :  { %1267 = vmatpush1.bf16.msra.mxu0 %v2313_v29  ;;  %2047 = vmatprep.subr.bf16.mxu1 %v2358_v0  ;;  %v2367_v29 = vld [vmem:[#allocation8 + $0x14] ss:$8 sps:$4 sm:$0xff]   ;;  %v2397_v0 = vld [vmem:[#allocation10 + $0x28] sm:$0xff]  }
  0xf2   :  { %1268 = vmatprep.subr.bf16.mxu0 %v2318_v30  ;;  %v2365_v30 = vld [vmem:[#allocation8 + $0x10] ss:$8 sps:$4 sm:$0xff]  }
  0xf4   :  { %2048 = vmatpush3.bf16.msra.mxu1 %v2359_v1  ;;  %v2398_v1 = vld [vmem:[#allocation10 + $0x70] sm:$0xff]  }
  0xf5   :  { %1269 = vmatpush1.bf16.msra.mxu0 %v2316_v31  ;;  %2049 = vmatprep.subr.bf16.mxu1 %v2360_v2  ;;  %v2370_v31 = vld [vmem:[#allocation8 + $0x24] ss:$8 sps:$4 sm:$0xff]   ;;  %v2399_v2 = vld [vmem:[#allocation10 + $0x30] sm:$0xff]  }
  0xf6   :  { %1270 = vmatprep.subr.bf16.mxu0 %v2321_v32  ;;  %v2368_v32 = vld [vmem:[#allocation8 + $0x20] ss:$8 sps:$4 sm:$0xff]  }
  0xf8   :  { %2050 = vmatpush3.bf16.msra.mxu1 %v2361_v3  ;;  %v2400_v3 = vld [vmem:[#allocation10 + $0x78] sm:$0xff]  }
  0xf9   :  { %1271 = vmatpush1.bf16.msra.mxu0 %v2319_v33  ;;  %1586 = vmatprep.subr.bf16.mxu1 %v2364_v4  ;;  %v2373_v33 = vld [vmem:[#allocation8 + $0x34] ss:$8 sps:$4 sm:$0xff]  }
  0xfa   :  { %1272 = vmatprep.subr.bf16.mxu0 %v2324_v34  ;;  %v2371_v34 = vld [vmem:[#allocation8 + $0x30] ss:$8 sps:$4 sm:$0xff]  }
  0xfb   :  { %v2401_v4 = vld [vmem:[#allocation10 + $0x38] sm:$0xff]  }
  0xfd   :  { %1273 = vmatpush1.bf16.msra.mxu0 %v2322_v35  ;;  %v2376_v35 = vld [vmem:[#allocation8 + $0x44] ss:$8 sps:$4 sm:$0xff]  }
  0xfe   :  { %1274 = vmatprep.subr.bf16.mxu0 %v2327_v36  ;;  %v2374_v36 = vld [vmem:[#allocation8 + $0x40] ss:$8 sps:$4 sm:$0xff]  }
 0x101   :  { %1275 = vmatpush1.bf16.msra.mxu0 %v2325_v37  ;;  %v2379_v37 = vld [vmem:[#allocation8 + $0x54] ss:$8 sps:$4 sm:$0xff]  }
 0x102   :  { %1276 = vmatprep.subr.bf16.mxu0 %v2330_v38  ;;  %v2377_v38 = vld [vmem:[#allocation8 + $0x50] ss:$8 sps:$4 sm:$0xff]  }
 0x105   :  { %1277 = vmatpush1.bf16.msra.mxu0 %v2328_v39  ;;  %v2382_v39 = vld [vmem:[#allocation8 + $0x64] ss:$8 sps:$4 sm:$0xff]  }
 0x106   :  { %1278 = vmatprep.subr.bf16.mxu0 %v2333_v40  ;;  %v2380_v40 = vld [vmem:[#allocation8 + $0x60] ss:$8 sps:$4 sm:$0xff]  }
 0x109   :  { %1279 = vmatpush1.bf16.msra.mxu0 %v2331_v41  ;;  %v2385_v41 = vld [vmem:[#allocation8 + $0x74] ss:$8 sps:$4 sm:$0xff]  }
 0x10a   :  { %1280 = vmatprep.subr.bf16.mxu0 %v2336_v42  ;;  %v2383_v42 = vld [vmem:[#allocation8 + $0x70] ss:$8 sps:$4 sm:$0xff]  }
 0x10d   :  { %1281 = vmatpush1.bf16.msra.mxu0 %v2334_v43  ;;  %v2551_v43 = vmov 0  }
 0x10e   :  { %1282 = vmatprep.subr.bf16.mxu0 %v2339_v44  ;;  %v2386_v44 = vld [vmem:[#allocation10 + $0x40] sm:$0xff]  }
 0x111   :  { %1283 = vmatpush1.bf16.msra.mxu0 %v2337_v45 }
 0x112   :  { %1284 = vmatprep.subr.bf16.mxu0 %v2342_v46  ;;  %v1985_v46 = vld [vmem:[%s2703_s4] ss:$0 sm:$0xff] }
 0x115   :  { %1285 = vmatpush1.bf16.msra.mxu0 %v2340_v47 }
 0x116   :  { %1286 = vmatprep.subr.bf16.mxu0 %v2345_v48 }
 0x119   :  { %1287 = vmatpush1.bf16.msra.mxu0 %v2343_v49 }
 0x11c   :  { %1289 = vmatmul.mubr.bf16.vlgmr.msra.gmra.mrb[0].mxu0 %v118_v51 }
 0x1ae   :  { %v1167_v5 = vpop.f32.mrb[0].mxu1 }
 0x1af   :  { %v1169_v6 = vpop.f32.mrb[1].mxu1  ;;  %v2079_v16 = vadd.f32 %v1167_v5, %v285_v14  ;;  %v1494_v5 = vld [vmem:[%s2705_s6] sm:$0x3] }
 0x1b0   :  { %v1171_v7 = vpop.f32.mrb[2].mxu1  ;;  %v2081_v17 = vadd.f32 %v1169_v6, %v289_v15  ;;  %v1499_v6 = vrot.slane %v1494_v5, %v284_v11  ;;  %v2018_v11 = vld [vmem:[%s2707_s8] ss:$0 sm:$0xff] }
 0x1b1   :  { %v1172_v8 = vpop.f32.mrb[3].mxu1  ;;  %v1503_v7 = vrot.slane %v1494_v5, %v288_v13 }
 0x1ef   :  { %v1290_v18 = vpop.f32.mrb[0].mxu0 }
 0x1f0   :  { %v2080_v19 = vadd.f32 %v2079_v16, %v1290_v18  ;;  %v1292_v20 = vpop.f32.mrb[1].mxu0 }
 0x1f1   :  { %v2082_v21 = vadd.f32 %v2081_v17, %v1292_v20  ;;  %v1294_v22 = vpop.f32.mrb[2].mxu0 }
 0x1f2   :  { %v1297_v23 = vmax.f32 %v2080_v19, 0.0  ;;  %v1295_v24 = vpop.f32.mrb[3].mxu0 }
 0x1f3   :  { %v1298_v25 = vmax.f32 %v2082_v21, 0.0 }
 0x1f4   :  { %v1299_v28 = vpack.c.bf16 %v1297_v23, %v1297_v23 }
 0x1f5   :  { %v1300_v26 = vpack.c.bf16 %v1298_v25, %v1298_v25 }
 0x1f7   :  { %1468 = vmatprep.mubr.bf16.mxu1 %v1300_v26 }
 0x1f8   :  { %1469 = vmatmul.mubr.bf16.vlgmr.msra.gmra.mrb[4].mxu1 %v1299_v28 }
 0x1f9   :  { %1587 = vmatpush1.bf16.msra.mxu1 %v2362_v27  ;;  %1618 = vmatprep.mubr.bf16.mxu1 %v2551_v43 }
 0x1fa   :  { %1588 = vmatprep.subr.bf16.mxu1 %v2367_v29 }
 0x1fd   :  { %1589 = vmatpush1.bf16.msra.mxu1 %v2365_v30 }
 0x1fe   :  { %1590 = vmatprep.subr.bf16.mxu1 %v2370_v31 }
 0x201   :  { %1591 = vmatpush1.bf16.msra.mxu1 %v2368_v32 }
 0x202   :  { %1592 = vmatprep.subr.bf16.mxu1 %v2373_v33 }
 0x205   :  { %1593 = vmatpush1.bf16.msra.mxu1 %v2371_v34 }
 0x206   :  { %1594 = vmatprep.subr.bf16.mxu1 %v2376_v35 }
 0x209   :  { %1595 = vmatpush1.bf16.msra.mxu1 %v2374_v36 }
 0x20a   :  { %1596 = vmatprep.subr.bf16.mxu1 %v2379_v37 }
 0x20d   :  { %1597 = vmatpush1.bf16.msra.mxu1 %v2377_v38 }
 0x20e   :  { %1598 = vmatprep.subr.bf16.mxu1 %v2382_v39 }
 0x211   :  { %1599 = vmatpush1.bf16.msra.mxu1 %v2380_v40 }
 0x212   :  { %1600 = vmatprep.subr.bf16.mxu1 %v2385_v41 }
 0x215   :  { %1601 = vmatpush1.bf16.msra.mxu1 %v2383_v42 }
 0x216   :  { %2057 = vmatprep.subr.bf16.mxu1 %v2386_v44 }
 0x2cb   :  { %v2051_v45 = vpop.f32.mrb[4].mxu1 }
 0x2cc   :  { %v2052_v47 = vpop.f32.mrb[5].mxu1 }
 0x2cd   :  { %v2053_v48 = vadd.f32 %v2052_v47, %v2051_v45  ;;  %v2054_v49 = vpop.f32.mrb[6].mxu1 }
 0x2ce   :  { %v2055_v50 = vpop.f32.mrb[7].mxu1 }
 0x2cf   :  { %v1471_v51 = vadd.f32 %v2053_v48, %v1985_v46 }
 0x2d1   :  { %v1476_v52 = vmax.f32 %v1471_v51, 0.0 }
 0x2d3   :  { %v1477_v54 = vpack.c.bf16 %v1476_v52, %v1476_v52 }
 0x2d5   :  { %1619 = vmatmul.mubr.bf16.vlgmr.msra.gmra.mrb[8].mxu1 %v1477_v54 }
 0x2d6   :  { %2058 = vmatpush3.bf16.msra.mxu1 %v2387_v53 }
 0x2d7   :  { %2059 = vmatprep.subr.bf16.mxu1 %v2388_v55 }
 0x2da   :  { %2060 = vmatpush3.bf16.msra.mxu1 %v2389_v56 }
 0x2db   :  { %2061 = vmatprep.subr.bf16.mxu1 %v2390_v57 }
 0x2de   :  { %2062 = vmatpush3.bf16.msra.mxu1 %v2391_v58 }
 0x2df   :  { %2063 = vmatprep.subr.bf16.mxu1 %v2392_v59 }
 0x2e2   :  { %2064 = vmatpush3.bf16.msra.mxu1 %v2393_v60 }
 0x2e3   :  { %2065 = vmatprep.subr.bf16.mxu1 %v2394_v61 }
 0x2e6   :  { %2066 = vmatpush3.bf16.msra.mxu1 %v2395_v62 }
 0x2e7   :  { %2067 = vmatprep.subr.bf16.mxu1 %v2396_v63 }
 0x2ea   :  { %2068 = vmatpush3.bf16.msra.mxu1 %v2397_v0 }
 0x2eb   :  { %2069 = vmatprep.subr.bf16.mxu1 %v2398_v1 }
 0x2ee   :  { %2070 = vmatpush3.bf16.msra.mxu1 %v2399_v2 }
 0x2ef   :  { %2071 = vmatprep.subr.bf16.mxu1 %v2400_v3 }
 0x2f2   :  { %2072 = vmatpush3.bf16.msra.mxu1 %v2401_v4 }
 0x3a8   :  { %v1620_v8 = vpop.f32.mrb[8].mxu1 }
 0x3a9   :  { %v1621_v9 = vadd.f32 %v1620_v8, %v1499_v6  ;;  %v1622_v12 = vpop.f32.mrb[9].mxu1 }
 0x3aa   :  { %v1623_v14 = vadd.f32 %v1622_v12, %v1503_v7  ;;  %v1624_v15 = vpop.f32.mrb[10].mxu1 }
 0x3ab   :  { %v1627_v16 = vmax.f32 %v1621_v9, 0.0  ;;  %v1625_v17 = vpop.f32.mrb[11].mxu1 }
 0x3ac   :  { %v1628_v18 = vmax.f32 %v1623_v14, 0.0 }
 0x3ad   :  { %v1629_v20 = vpack.c.bf16 %v1627_v16, %v1627_v16 }
 0x3ae   :  { %v1630_v19 = vpack.c.bf16 %v1628_v18, %v1628_v18 }
 0x3b0   :  { %1798 = vmatprep.mubr.bf16.mxu1 %v1630_v19 }
 0x3b1   :  { %1799 = vmatmul.mubr.bf16.vlgmr.msra.gmra.mrb[12].mxu1 %v1629_v20 }
 0x484   :  { %v2073_v21 = vpop.f32.mrb[12].mxu1 }
 0x485   :  { %v2074_v22 = vpop.f32.mrb[13].mxu1 }
 0x486   :  { %v2075_v10 = vadd.f32 %v2074_v22, %v2073_v21  ;;  %v2076_v13 = vpop.f32.mrb[14].mxu1 }
 0x487   :  { %v2077_v23 = vpop.f32.mrb[15].mxu1 }
 0x488   :  { %v1801_v24 = vadd.f32 %v2075_v10, %v2018_v11 }
 0x48a   :  { %v1806_v25 = vpack.c.bf16 %v1801_v24, %v1801_v24 }
 0x48c   :  { %1807 = vst [vmem:[#allocation11] sm:$0xf] %v1806_v25 }
 0x48d   :  { %2523 = shalt.err (!%p2520_p2)
}
 0x48e   :  { %s2524_s8 = scalar_lea.hbm %s2708_s9, 64 }
 0x48f   :  { %p2525_p3 = scmp.ne.s32.totalorder %s2708_s9, %s2524_s8  ;;  %p2528_p4 = scmp.lt.u32.totalorder %s2524_s8, %s2708_s9 }
 0x491   :  { %p2530_p5 = pnand %p2528_p4, %p2525_p3 }
 0x493   :  { %2533 = shalt.err (!%p2530_p5)
}
 0x494   :  { %1817 = dma.vmem_to_hbm [thread:$0]  %s1815_s11, 64, %s2708_s9, [#allocation4]  }
 0x495   :  { %2540 = dma.done.wait [#allocation4], 64  }
 0x496   :  { %2541 = vsyncadd [#allocation4], 4294967232 }
 0x497   :  { %1821 = vsyncpa [#allocation3], 1 }
 0x498   :  { %1822 = vsyncpa [#allocation6], 1 }
 0x499   :  { %1823 = vsyncpa [#allocation9], 1 }
 0x49a   :  { %1824 = vsyncpa [#allocation4], 1 }

</bundles_post_ra>
